<compile_context>
chip_gen: v7x
topology: tpu7x:2x2x1
jax: 0.10.0
libtpu: 0.0.40
codegen_flags: <defaults>
</compile_context>

<pallas_src>
import functools

import jax
import jax.numpy as jnp
from jax.experimental import pallas as pl
from jax.experimental.pallas import tpu as pltpu


_LANE = 128
_DEFAULT_VMEM_LIMIT = 32 * 1024 * 1024  # safe on v5e / v6e / v7x


def _sublane_multiple(dtype):
    """Minimum sublane tile for a dtype (8 for f32, 16 for bf16, 32 for int8)."""
    itemsize = jnp.dtype(dtype).itemsize
    return 8 * max(1, 4 // itemsize)


def _pick_tile(extent, requested, granule):
    """Largest legal tile <= requested: full extent for small dims, otherwise a
    multiple of `granule` (sublane / lane quantum)."""
    if extent <= requested:
        return extent  # block == full array dim is always legal
    return max(granule, (requested // granule) * granule)


# ---------------------------------------------------------------------------
# ImplicitA / ImplicitM: per-channel elementwise ops on NCHW tensors
# ---------------------------------------------------------------------------

def _scale_rows_kernel(x_ref, s_ref, o_ref):
    # x_ref: (rt, ct), s_ref: (rt, 1) -> lane-broadcast multiply on the VPU.
    o_ref[...] = x_ref[...] * s_ref[...]


def _shift_rows_kernel(x_ref, b_ref, o_ref):
    o_ref[...] = x_ref[...] + b_ref[...]


def _rows_view(x, implicit):
    """Flatten NCHW to (rows, cols) plus a per-row copy of the (1,C,1,1) param.

    Prefers a lane-dense (multiple-of-128) column axis.
    """
    N, C, H, W = x.shape
    HW = H * W
    if HW % _LANE != 0 and W % _LANE == 0:
        rows, cols = N * C * H, W
        x2d = x.reshape(rows, cols)
        p = jnp.broadcast_to(implicit.reshape(1, C, 1), (N, C, H)).reshape(rows, 1)
    else:
        rows, cols = N * C, HW
        x2d = x.reshape(rows, cols)
        p = jnp.broadcast_to(implicit.reshape(1, C), (N, C)).reshape(rows, 1)
    return x2d, p.astype(x.dtype)


def _rowwise_pallas(kernel, x2d, p, *, row_tile, col_tile, vmem_limit_bytes):
    R, L = x2d.shape
    rt = _pick_tile(R, row_tile, _sublane_multiple(x2d.dtype))
    ct = _pick_tile(L, col_tile, _LANE)
    grid = (pl.cdiv(R, rt), pl.cdiv(L, ct))
    itemsize = jnp.dtype(x2d.dtype).itemsize
    cost = pl.CostEstimate(
        flops=R * L,
        transcendentals=0,
        bytes_accessed=(2 * R * L + R) * itemsize,
    )
    return pl.pallas_call(
        kernel,
        out_shape=jax.ShapeDtypeStruct((R, L), x2d.dtype),
        grid_spec=pltpu.PrefetchScalarGridSpec(
            num_scalar_prefetch=0,
            grid=grid,
            in_specs=[
                pl.BlockSpec((rt, ct), lambda i, j: (i, j)),
                pl.BlockSpec((rt, 1), lambda i, j: (i, 0)),
            ],
            out_specs=pl.BlockSpec((rt, ct), lambda i, j: (i, j)),
        ),
        compiler_params=pltpu.CompilerParams(
            dimension_semantics=("parallel", "parallel"),
            vmem_limit_bytes=vmem_limit_bytes,
        ),
        cost_estimate=cost,
    )(x2d, p)


def implicit_m(x, implicit, *, row_tile=256, col_tile=2048,
               vmem_limit_bytes=_DEFAULT_VMEM_LIMIT):
    """ImplicitM: y = implicit * x.  x: (N,C,H,W), implicit: (1,C,1,1)."""
    N, C, H, W = x.shape
    x2d, p = _rows_view(x, implicit)
    y2d = _rowwise_pallas(_scale_rows_kernel, x2d, p, row_tile=row_tile,
                          col_tile=col_tile, vmem_limit_bytes=vmem_limit_bytes)
    return y2d.reshape(N, C, H, W)


def implicit_a(x, implicit, *, row_tile=256, col_tile=2048,
               vmem_limit_bytes=_DEFAULT_VMEM_LIMIT):
    """ImplicitA: y = implicit + x.  x: (N,C,H,W), implicit: (1,C,1,1)."""
    N, C, H, W = x.shape
    x2d, p = _rows_view(x, implicit)
    y2d = _rowwise_pallas(_shift_rows_kernel, x2d, p, row_tile=row_tile,
                          col_tile=col_tile, vmem_limit_bytes=vmem_limit_bytes)
    return y2d.reshape(N, C, H, W)


# ---------------------------------------------------------------------------
# Fused IBin detection-head level (training path):
#     y = implicit_m * (conv1x1(x + implicit_a) + bias)
# followed by .view(bs, na, no, ny, nx).permute(0, 1, 3, 4, 2)
# ---------------------------------------------------------------------------

def _ibin_head_kernel(x_ref, w_ref, b_ref, ia_ref, im_ref, o_ref):
    # x_ref : (C_in, tp)    spatial tile of one sample (channels x pixels)
    # w_ref : (C_out, C_in) 1x1-conv weight
    # b_ref : (C_out, 1)    conv bias
    # ia_ref: (C_in, 1)     ImplicitA per-input-channel bias
    # im_ref: (C_out, 1)    ImplicitM per-output-channel scale
    xa = x_ref[...].astype(jnp.float32) + ia_ref[...].astype(jnp.float32)
    acc = jnp.dot(w_ref[...].astype(jnp.float32), xa,
                  preferred_element_type=jnp.float32)
    y = im_ref[...] * (acc + b_ref[...])
    o_ref[...] = y.astype(o_ref.dtype)


def ibin_level_forward(x, conv_w, conv_b, implicit_a_p, implicit_m_p, *,
                       na, no, col_tile=512,
                       vmem_limit_bytes=_DEFAULT_VMEM_LIMIT):
    """One IBin level, training forward, returning (bs, na, ny, nx, no)."""
    N, C_in, H, W = x.shape
    HW = H * W
    C_out = conv_w.shape[0]
    assert C_out == na * no

    # Layout-only glue: NCHW -> (N, C, H*W); params -> per-channel columns.
    x3 = x.reshape(N, C_in, HW)
    w2 = conv_w.reshape(C_out, C_in)
    b2 = conv_b.reshape(C_out, 1).astype(jnp.float32)
    ia2 = implicit_a_p.reshape(C_in, 1).astype(x.dtype)
    im2 = implicit_m_p.reshape(C_out, 1).astype(jnp.float32)

    tp = _pick_tile(HW, col_tile, _LANE)
    grid = (N, pl.cdiv(HW, tp))

    itemsize = jnp.dtype(x.dtype).itemsize
    cost = pl.CostEstimate(
        flops=2 * N * C_out * C_in * HW,
        transcendentals=0,
        bytes_accessed=(N * (C_in + C_out) * HW + C_out * C_in) * itemsize,
    )

    y3 = pl.pallas_call(
        _ibin_head_kernel,
        out_shape=jax.ShapeDtypeStruct((N, C_out, HW), x.dtype),
        grid_spec=pltpu.PrefetchScalarGridSpec(
            num_scalar_prefetch=0,
            grid=grid,
            in_specs=[
                pl.BlockSpec((None, C_in, tp), lambda n, p: (n, 0, p)),
                pl.BlockSpec((C_out, C_in), lambda n, p: (0, 0)),
                pl.BlockSpec((C_out, 1), lambda n, p: (0, 0)),
                pl.BlockSpec((C_in, 1), lambda n, p: (0, 0)),
                pl.BlockSpec((C_out, 1), lambda n, p: (0, 0)),
            ],
            out_specs=pl.BlockSpec((None, C_out, tp), lambda n, p: (n, 0, p)),
        ),
        compiler_params=pltpu.CompilerParams(
            dimension_semantics=("parallel", "parallel"),
            vmem_limit_bytes=vmem_limit_bytes,
        ),
        cost_estimate=cost,
    )(x3, w2, b2, ia2, im2)

    # Layout glue identical to .view(bs, na, no, ny, nx).permute(0, 1, 3, 4, 2).
    return jnp.transpose(y3.reshape(N, na, no, H, W), (0, 1, 3, 4, 2))


# TODO(synk): IBin's inference/decode path (sigmoid + SigmoidBin argmax bin
# decoding, grid/anchor offsets) is not translated — the original references
# undefined self.x_bin_sigmoid / self.y_bin_sigmoid — so only the training
# forward (conv head + implicits + reshape) is implemented here.


if __name__ == "__main__":
    key = jax.random.PRNGKey(0)
    k = jax.random.split(key, 6)

    # Small shapes consistent with one IBin level: bs=2, C_in=4, 16x16 map.
    N, C, H, W = 2, 4, 16, 16
    x = jax.random.normal(k[0], (N, C, H, W), dtype=jnp.float32)

    # ImplicitA ~ N(0, 0.02), ImplicitM ~ N(1, 0.02) (nn.init.normal_).
    ia_p = 0.0 + 0.02 * jax.random.normal(k[1], (1, C, 1, 1), dtype=jnp.float32)
    im_in = 1.0 + 0.02 * jax.random.normal(k[2], (1, C, 1, 1), dtype=jnp.float32)

    # --- standalone ImplicitM / ImplicitA kernels --------------------------
    y_m = jax.block_until_ready(jax.jit(implicit_m)(x, im_in))
    y_a = jax.block_until_ready(jax.jit(implicit_a)(x, ia_p))
    assert y_m.shape == x.shape and y_a.shape == x.shape
    assert jnp.allclose(y_m, im_in * x, atol=1e-6, rtol=1e-6)
    assert jnp.allclose(y_a, ia_p + x, atol=1e-6, rtol=1e-6)

    # --- fused IBin head level (training path) ------------------------------
    nc_cls, bin_count, na = 2, 21, 2
    no = nc_cls + 3 + 2 * (bin_count + 1)        # 49 outputs per anchor
    c_out = no * na                               # 98 conv output channels
    conv_w = 0.05 * jax.random.normal(k[3], (c_out, C, 1, 1), dtype=jnp.float32)
    conv_b = 0.05 * jax.random.normal(k[4], (c_out,), dtype=jnp.float32)
    im_out = 1.0 + 0.02 * jax.random.normal(k[5], (1, c_out, 1, 1),
                                            dtype=jnp.float32)

    head = jax.jit(functools.partial(ibin_level_forward, na=na, no=no))
    y_head = jax.block_until_ready(head(x, conv_w, conv_b, ia_p, im_out))
    assert y_head.shape == (N, na, H, W, no)

    # Pure-JAX reference of the same training-path math.
    xa_ref = x + ia_p
    y_ref = jnp.einsum("oc,nchw->nohw", conv_w.reshape(c_out, C), xa_ref,
                       precision=jax.lax.Precision.HIGHEST)
    y_ref = im_out * (y_ref + conv_b.reshape(1, c_out, 1, 1))
    y_ref = jnp.transpose(y_ref.reshape(N, na, no, H, W), (0, 1, 3, 4, 2))
    assert jnp.allclose(y_head, y_ref, atol=1e-4, rtol=1e-4)

    print("KERNEL_OK")
</pallas_src>

<mosaic_0001>
module attributes {stable_mosaic.version = 11 : i64} {
  func.func @_scale_rows_kernel(%arg0: i32, %arg1: i32, %arg2: memref<8x256xf32, #tpu.memory_space<vmem>>, %arg3: memref<8x1xf32, #tpu.memory_space<vmem>>, %arg4: memref<8x256xf32, #tpu.memory_space<vmem>>) attributes {dimension_semantics = [#tpu.dimension_semantics<parallel>, #tpu.dimension_semantics<parallel>], iteration_bounds = array<i64: 1, 1>, scalar_prefetch = 0 : i64, scratch_operands = 0 : i64, tpu.core_type = #tpu.core_type<tc>, window_params = [{transform_indices = @transform_0, window_bounds = array<i64: 8, 256>}, {transform_indices = @transform_1, window_bounds = array<i64: 8, 1>}, {transform_indices = @transform_2, window_bounds = array<i64: 8, 256>}]} {
    %c0 = arith.constant 0 : index
    %c0_0 = arith.constant 0 : index
    %0 = vector.load %arg2[%c0, %c0_0] : memref<8x256xf32, #tpu.memory_space<vmem>>, vector<8x256xf32>
    %c0_1 = arith.constant 0 : index
    %c0_2 = arith.constant 0 : index
    %1 = vector.load %arg3[%c0_1, %c0_2] : memref<8x1xf32, #tpu.memory_space<vmem>>, vector<8x1xf32>
    %2 = vector.broadcast %1 : vector<8x1xf32> to vector<8x256xf32>
    %3 = arith.mulf %0, %2 : vector<8x256xf32>
    %c0_3 = arith.constant 0 : index
    %c0_4 = arith.constant 0 : index
    %4 = vector.load %arg4[%c0_3, %c0_4] : memref<8x256xf32, #tpu.memory_space<vmem>>, vector<8x256xf32>
    tpu.vector_store %arg4[%c0_3, %c0_4], %3 {strides = array<i32>} : memref<8x256xf32, #tpu.memory_space<vmem>>, vector<8x256xf32>,
    return
  }
  func.func @transform_0(%arg0: i32, %arg1: i32) -> (i32, i32) {
    %c0_i32 = arith.constant 0 : i32
    return %arg0, %arg1 : i32, i32
  }
  func.func @transform_1(%arg0: i32, %arg1: i32) -> (i32, i32) {
    %c0_i32 = arith.constant 0 : i32
    %c0_i32_0 = arith.constant 0 : i32
    return %arg0, %c0_i32 : i32, i32
  }
  func.func @transform_2(%arg0: i32, %arg1: i32) -> (i32, i32) {
    %c0_i32 = arith.constant 0 : i32
    return %arg0, %arg1 : i32, i32
  }
}

</mosaic_0001>

<bundles_post_ra>
// kernel: implicit_m.1
= control target key start
LH: loop header
LB: loop body
LE: loop exit
PB: predicated region body
PF: predicated region fallthrough
CT: control target
= control target key end

     0   :  { %v29_v0 = vmov 0   ;;  %s60_s1 = inlined_call_operand.vmem [shape: f32[8,1], index: 1, kind: input, shape index: {}]   ;;  %s61_s0 = inlined_call_operand.vmem [shape: f32[8,256], index: 0, kind: input, shape index: {}]   ;;  %s62_s2 = inlined_call_operand.vmem [shape: f32[8,256], index: 2, kind: output, shape index: {}]  }
   0x1   :  { %28 = vset.pattern.permute.xlu0 %v29_v0  ;;  %v13_v1 = vld [vmem:[%s60_s1] sm:$0xff]  ;;  %v12_v3 = vld [vmem:[%s61_s0 + $0x8] sm:$0xff] }
   0x2   :  { %16 = vperm.xlu0 %28, %v13_v1   ;;  %v11_v2 = vld [vmem:[%s61_s0] sm:$0xff] }
  0x81   :  { %v17_v4 = vpop.permute.xlu0 %16 }
  0x82   :  { %v19_v5 = vmul.f32 %v17_v4, %v11_v2  ;;  %v20_v6 = vmul.f32 %v17_v4, %v12_v3 }
  0x84   :  { %21 = vst [vmem:[%s62_s2] sm:$0xff] %v19_v5  ;;  %22 = vst [vmem:[%s62_s2 + $0x8] sm:$0xff] %v20_v6 }

</bundles_post_ra>
